<compile_context>
chip_gen: v7x
topology: tpu7x:2x2x1
jax: 0.10.0
libtpu: 0.0.40
codegen_flags: <defaults>
</compile_context>

<pallas_src>
import functools
import math

import jax
import jax.numpy as jnp
import numpy as np
from jax.experimental import pallas as pl
from jax.experimental.pallas import tpu as pltpu

_MIB = 1024 * 1024


def _device_kind():
    try:
        return jax.devices()[0].device_kind.lower()
    except Exception:
        return ""


def _vmem_capacity_bytes():
    try:
        return int(pltpu.get_tpu_info().vmem_capacity_bytes)
    except Exception:
        pass
    # Fallback: v7x has 64 MiB VMEM per TensorCore, older parts 128 MiB.
    return 64 * _MIB if "v7" in _device_kind() else 128 * _MIB


def _round_up(x, m):
    return ((x + m - 1) // m) * m


def _pick_ti(I, target):
    """Pick a lane-aligned intermediate tile `ti` and the padded I it implies."""
    if I <= 128:
        return I, I  # tiny I: single full-extent tile (allowed by BlockSpec rules)
    target = max(128, min(target, I))
    t = (target // 128) * 128
    # Prefer the largest multiple-of-128 divisor of I (no padding needed).
    d = t
    while d >= 128:
        if I % d == 0:
            return d, I
        d -= 128
    # Otherwise pad I up with zero columns/rows to a multiple of the target.
    return t, _round_up(I, t)


def _footprint_bytes(tm, ti, H, in_bytes=2, out_bytes=4):
    """Double-buffered VMEM working set of one grid step."""
    x_blk = tm * H * in_bytes
    wgu_blk = H * 2 * ti * in_bytes
    wd_blk = ti * H * in_bytes
    o_blk = tm * H * out_bytes
    return 2 * (x_blk + wgu_blk + wd_blk + o_blk)


def prepare_mlp_params(w_gate, w_up, w_down, *, tm=None, ti=None,
                       compute_dtype=jnp.bfloat16):
    """One-time weight prep: bf16 cast, gate/up interleaving, tile selection.

    w_gate/w_up: (H, I)  pre-transposed;  w_down: (I, H).
    """
    H, I = w_gate.shape
    capacity = _vmem_capacity_bytes()
    kind = _device_kind()

    if capacity <= 80 * _MIB:          # v7x-class (64 MiB VMEM per TC)
        tm_d, ti_d = 256, 256
    elif "v5" in kind:                 # v5e/v5p roofline balances near tm~256-384
        tm_d, ti_d = 384, 512
    else:                              # v6e and other 128 MiB parts
        tm_d, ti_d = 512, 512
    tm = tm_d if tm is None else tm
    ti_target = ti_d if ti is None else ti

    tm = max(8, _round_up(min(tm, 1024), 8))
    ti, I_pad = _pick_ti(I, ti_target)

    # Shrink tiles until the double-buffered working set fits the VMEM budget.
    budget = int(0.85 * capacity)
    while _footprint_bytes(tm, ti, H) > budget:
        if ti > 128:
            new_ti, new_I_pad = _pick_ti(I, max(128, ti - 128))
            if new_ti < ti:
                ti, I_pad = new_ti, new_I_pad
                continue
        if tm > 64:
            tm = max(64, tm // 2)
            continue
        break

    vmem_limit = int(min(max(_footprint_bytes(tm, ti, H) + 16 * _MIB, 32 * _MIB),
                         int(0.9 * capacity)))

    cd = compute_dtype
    wg = w_gate.astype(cd)
    wu = w_up.astype(cd)
    wd = w_down.astype(cd)
    if I_pad != I:
        # Zero padding is exact: SiLU(0) * 0 = 0 and padded down-rows are zero.
        wg = jnp.pad(wg, ((0, 0), (0, I_pad - I)))
        wu = jnp.pad(wu, ((0, 0), (0, I_pad - I)))
        wd = jnp.pad(wd, ((0, I_pad - I), (0, 0)))

    n_i = I_pad // ti
    # Interleave per intermediate tile: columns = [g_0 | u_0 | g_1 | u_1 | ...]
    wgu = jnp.concatenate(
        [wg.reshape(H, n_i, ti), wu.reshape(H, n_i, ti)], axis=-1
    ).reshape(H, 2 * I_pad)

    return dict(wgu=wgu, wd=wd, tm=tm, ti=ti, n_i=n_i, H=H,
                vmem_limit=vmem_limit, compute_dtype=cd)


def _mlp_kernel(x_ref, wgu_ref, wd_ref, o_ref, *, ti):
    """Grid = (token_tiles, intermediate_tiles); i is the reduction axis.

    The output block's index_map ignores i, so it stays resident in VMEM and
    is used directly as the f32 accumulator (no scratch, single HBM writeback
    per token tile).  One MXU matmul produces [gate | up] for this i-tile.
    """
    i = pl.program_id(1)

    x = x_ref[...]                                                     # (tm, H) bf16
    gu = jnp.dot(x, wgu_ref[...], preferred_element_type=jnp.float32)  # (tm, 2*ti) f32
    g = gu[:, :ti]
    u = gu[:, ti:]
    h = (g * jax.nn.sigmoid(g)) * u                                    # SiLU(gate) * up
    partial = jnp.dot(h.astype(wd_ref.dtype), wd_ref[...],
                      preferred_element_type=jnp.float32)              # (tm, H) f32

    @pl.when(i == 0)
    def _():
        o_ref[...] = partial          # first reduction step: write, no memset

    @pl.when(i > 0)
    def _():
        o_ref[...] += partial


def mlp_forward(x, params):
    """x: (B, S, H).  Returns (B, S, H) float32."""
    H = params["H"]
    ti = params["ti"]
    n_i = params["n_i"]
    cd = params["compute_dtype"]

    B, S, _ = x.shape
    T = B * S
    x2d = x.reshape(T, H)
    if x2d.dtype != cd:
        x2d = x2d.astype(cd)

    # Token tile: shrink for small T; Pallas masks the ragged last tile's writes.
    tm = min(params["tm"], max(8, _round_up(T, 8)))
    n_t = pl.cdiv(T, tm)

    out2d = pl.pallas_call(
        functools.partial(_mlp_kernel, ti=ti),
        out_shape=jax.ShapeDtypeStruct((T, H), jnp.float32),
        grid_spec=pltpu.PrefetchScalarGridSpec(
            num_scalar_prefetch=0,
            grid=(n_t, n_i),
            in_specs=[
                pl.BlockSpec((tm, H), lambda t, i: (t, 0)),        # x token tile
                pl.BlockSpec((H, 2 * ti), lambda t, i: (0, i)),    # [gate|up] weight tile
                pl.BlockSpec((ti, H), lambda t, i: (i, 0)),        # down_proj weight tile
            ],
            out_specs=pl.BlockSpec((tm, H), lambda t, i: (t, 0)),  # resident across i
        ),
        compiler_params=pltpu.CompilerParams(
            dimension_semantics=("parallel", "arbitrary"),
            vmem_limit_bytes=params["vmem_limit"],
        ),
    )(x2d, params["wgu"], params["wd"])

    return out2d.reshape(B, S, H)


def mlp_reference(x, w_gate, w_up, w_down):
    """Pure-JAX f32 reference matching the PyTorch module's forward."""
    B, S, H = x.shape
    x2d = x.reshape(-1, H)
    y = (jax.nn.silu(x2d @ w_gate) * (x2d @ w_up)) @ w_down
    return y.reshape(B, S, H)


if __name__ == "__main__":
    # Small shapes consistent with the module: batch=2, seq=8, hidden=32, intermediate=64.
    B, S, H, I = 2, 8, 32, 64
    key = jax.random.PRNGKey(0)
    k_x, k_g, k_u, k_d = jax.random.split(key, 4)

    x = jax.random.normal(k_x, (B, S, H), jnp.float32)

    scale_h = 1.0 / math.sqrt(H)   # nn.Linear-style uniform init bound (fan_in = H)
    scale_i = 1.0 / math.sqrt(I)   # fan_in = I for down_proj
    w_gate = jax.random.uniform(k_g, (H, I), jnp.float32, -scale_h, scale_h)
    w_up = jax.random.uniform(k_u, (H, I), jnp.float32, -scale_h, scale_h)
    w_down = jax.random.uniform(k_d, (I, H), jnp.float32, -scale_i, scale_i)

    params = prepare_mlp_params(w_gate, w_up, w_down)   # one-time: cast/pack weights
    out = mlp_forward(x, params)
    jax.block_until_ready(out)

    ref = mlp_reference(x, w_gate, w_up, w_down)
    np.testing.assert_allclose(np.asarray(out), np.asarray(ref), rtol=2e-2, atol=2e-2)

    print("KERNEL_OK")
</pallas_src>

<mosaic_0001>
module attributes {stable_mosaic.version = 11 : i64} {
  func.func @_mlp_kernel(%arg0: i32, %arg1: i32, %arg2: memref<16x32xbf16, #tpu.memory_space<vmem>>, %arg3: memref<32x128xbf16, #tpu.memory_space<vmem>>, %arg4: memref<64x32xbf16, #tpu.memory_space<vmem>>, %arg5: memref<16x32xf32, #tpu.memory_space<vmem>>) attributes {dimension_semantics = [#tpu.dimension_semantics<parallel>, #tpu.dimension_semantics<arbitrary>], iteration_bounds = array<i64: 1, 1>, scalar_prefetch = 0 : i64, scratch_operands = 0 : i64, tpu.core_type = #tpu.core_type<tc>, window_params = [{transform_indices = @transform_0, window_bounds = array<i64: 16, 32>}, {transform_indices = @transform_1, window_bounds = array<i64: 32, 128>}, {transform_indices = @transform_2, window_bounds = array<i64: 64, 32>}, {transform_indices = @transform_3, window_bounds = array<i64: 16, 32>}]} {
    %c0 = arith.constant 0 : index
    %c0_0 = arith.constant 0 : index
    %0 = vector.load %arg2[%c0, %c0_0] : memref<16x32xbf16, #tpu.memory_space<vmem>>, vector<16x32xbf16>
    %c0_1 = arith.constant 0 : index
    %c0_2 = arith.constant 0 : index
    %1 = vector.load %arg3[%c0_1, %c0_2] : memref<32x128xbf16, #tpu.memory_space<vmem>>, vector<32x128xbf16>
    %cst = arith.constant dense<0.000000e+00> : vector<16x128xf32>
    %2 = tpu.matmul %0, %1, %cst {dimension_numbers = #tpu.dot_dimension_numbers<[1], [0], [0], [1], [0, 0, 1, 1], [], []>} : vector<16x32xbf16>, vector<32x128xbf16>, vector<16x128xf32> -> vector<16x128xf32>
    %3 = vector.extract_strided_slice %2 {offsets = [0, 0], sizes = [16, 64], strides = [1, 1]} : vector<16x128xf32> to vector<16x64xf32>
    %4 = vector.extract_strided_slice %2 {offsets = [0, 64], sizes = [16, 64], strides = [1, 1]} : vector<16x128xf32> to vector<16x64xf32>
    %5 = arith.negf %3 : vector<16x64xf32>
    %6 = math.exp %5 : vector<16x64xf32>
    %cst_3 = arith.constant 1.000000e+00 : f32
    %7 = vector.broadcast %cst_3 : f32 to vector<16x64xf32>
    %8 = arith.addf %7, %6 : vector<16x64xf32>
    %9 = arith.divf %7, %8 : vector<16x64xf32>
    %10 = arith.mulf %3, %9 : vector<16x64xf32>
    %11 = arith.mulf %10, %4 : vector<16x64xf32>
    %12 = arith.truncf %11 : vector<16x64xf32> to vector<16x64xbf16>
    %c0_4 = arith.constant 0 : index
    %c0_5 = arith.constant 0 : index
    %13 = vector.load %arg4[%c0_4, %c0_5] : memref<64x32xbf16, #tpu.memory_space<vmem>>, vector<64x32xbf16>
    %cst_6 = arith.constant dense<0.000000e+00> : vector<16x32xf32>
    %14 = tpu.matmul %12, %13, %cst_6 {dimension_numbers = #tpu.dot_dimension_numbers<[1], [0], [0], [1], [0, 0, 1, 1], [], []>} : vector<16x64xbf16>, vector<64x32xbf16>, vector<16x32xf32> -> vector<16x32xf32>
    %c0_i32 = arith.constant 0 : i32
    %15 = arith.cmpi eq, %arg1, %c0_i32 : i32
    %16 = arith.extui %15 : i1 to i32
    %c0_i32_7 = arith.constant 0 : i32
    %17 = arith.cmpi ne, %16, %c0_i32_7 : i32
    scf.if %17 {
      %c0_10 = arith.constant 0 : index
      %c0_11 = arith.constant 0 : index
      %21 = vector.load %arg5[%c0_10, %c0_11] : memref<16x32xf32, #tpu.memory_space<vmem>>, vector<16x32xf32>
      tpu.vector_store %arg5[%c0_10, %c0_11], %14 {strides = array<i32>} : memref<16x32xf32, #tpu.memory_space<vmem>>, vector<16x32xf32>,
    } else {
    }
    %c0_i32_8 = arith.constant 0 : i32
    %18 = arith.cmpi sgt, %arg1, %c0_i32_8 : i32
    %19 = arith.extui %18 : i1 to i32
    %c0_i32_9 = arith.constant 0 : i32
    %20 = arith.cmpi ne, %19, %c0_i32_9 : i32
    scf.if %20 {
      %c0_10 = arith.constant 0 : index
      %c0_11 = arith.constant 0 : index
      %21 = vector.load %arg5[%c0_10, %c0_11] : memref<16x32xf32, #tpu.memory_space<vmem>>, vector<16x32xf32>
      %22 = arith.addf %21, %14 : vector<16x32xf32>
      %c0_12 = arith.constant 0 : index
      %c0_13 = arith.constant 0 : index
      %23 = vector.load %arg5[%c0_12, %c0_13] : memref<16x32xf32, #tpu.memory_space<vmem>>, vector<16x32xf32>
      tpu.vector_store %arg5[%c0_12, %c0_13], %22 {strides = array<i32>} : memref<16x32xf32, #tpu.memory_space<vmem>>, vector<16x32xf32>,
    } else {
    }
    return
  }
  func.func @transform_0(%arg0: i32, %arg1: i32) -> (i32, i32) {
    %c0_i32 = arith.constant 0 : i32
    %c0_i32_0 = arith.constant 0 : i32
    return %arg0, %c0_i32 : i32, i32
  }
  func.func @transform_1(%arg0: i32, %arg1: i32) -> (i32, i32) {
    %c0_i32 = arith.constant 0 : i32
    %c0_i32_0 = arith.constant 0 : i32
    return %c0_i32, %arg1 : i32, i32
  }
  func.func @transform_2(%arg0: i32, %arg1: i32) -> (i32, i32) {
    %c0_i32 = arith.constant 0 : i32
    %c0_i32_0 = arith.constant 0 : i32
    return %arg1, %c0_i32 : i32, i32
  }
  func.func @transform_3(%arg0: i32, %arg1: i32) -> (i32, i32) {
    %c0_i32 = arith.constant 0 : i32
    %c0_i32_0 = arith.constant 0 : i32
    return %arg0, %c0_i32 : i32, i32
  }
}

</mosaic_0001>

<bundles_post_ra>
// kernel: tpu_custom_call.1
= control target key start
LH: loop header
LB: loop body
LE: loop exit
PB: predicated region body
PF: predicated region fallthrough
CT: control target
= control target key end

     0   :  { %v302_v1 = vmov 0.0   ;;  %vm303_vm0 = vmmov 0   ;;  %s364_s0 = inlined_call_operand.vmem [shape: bf16[16,32], index: 0, kind: input, shape index: {}]   ;;  %s365_s1 = inlined_call_operand.vmem [shape: bf16[32,128], index: 1, kind: input, shape index: {}]   ;;  %s366_s2 = inlined_call_operand.vmem [shape: bf16[64,32], index: 2, kind: input, shape index: {}]   ;;  %s367_s3 = inlined_call_operand.hbm [shape: f32[16,32], index: 3, kind: output, shape index: {}]  }
   0x1   :  { %v263_v0 = vld [vmem:[%s365_s1] sm:$0xff]   ;;  %237 = vmatprep.subr.bf16.mxu0 %v302_v1  ;;  %245 = vmatprep.subr.bf16.mxu1 %v302_v1  ;;  %v264_v2 = vld [vmem:[%s365_s1 + $0x8] sm:$0xff]  }
   0x2   :  { %238 = vmatpush3.bf16.msra.mxu0 %v263_v0  ;;  %241 = vmatprep.mubr.msk.bf16.mxu0 %vm303_vm0, %v302_v1  ;;  %v265_v3 = vld [vmem:[%s364_s0] sm:$0xff]  }
   0x3   :  { %239 = vmatprep.subr.bf16.mxu0 %v302_v1  ;;  %253 = vmatprep.mubr.msk.bf16.mxu1 %vm303_vm0, %v302_v1 }
   0x4   :  { %8 = vsyncpa [#allocation3], 0  ;;  %vm39_vm1 = vcmask 261120   ;;  %v266_v4 = vld [vmem:[%s366_s2] sm:$0xff]   ;;  %v267_v5 = vld [vmem:[%s366_s2 + $0x8] sm:$0xff]   ;;  %s304_s24 = smov 64  }
   0x5   :  { %246 = vmatpush3.bf16.msra.mxu1 %v266_v4  ;;  %v268_v6 = vld [vmem:[%s366_s2 + $0x10] sm:$0xff]   ;;  %v269_v7 = vld [vmem:[%s366_s2 + $0x18] sm:$0xff]   ;;  %vm141_vm2 = vcmask 523264   ;;  %s305_s2 = smov [#allocation2]  }
   0x6   :  { %240 = vmatpush3.bf16.msra.mxu0 %v264_v2  ;;  %247 = vmatprep.subr.bf16.mxu1 %v302_v1  ;;  %s207_s25 = sshll.u32 %s305_s2, 4  ;;  %s208_s25 = int_to_ptr.vmem [resolvable:$true] %s207_s25 }
   0x7   :  { %s278_s26 = scalar_lea.vmem %s208_s25, 256  ;;  %p283_p1 = scmp.lt.s32.totalorder %s208_s25, %s208_s25 }
   0x8   :  { %p279_p0 = scmp.ne.s32.totalorder %s208_s25, %s278_s26  ;;  %p284_p2 = scmp.lt.s32.totalorder %s278_s26, %s278_s26 }
   0x9   :  { %242 = vmatmul.mubr.msk.bf16.vlgmr.msra.gmra.mrb[0].mxu0 %vm39_vm1, %v265_v3  ;;  %248 = vmatpush3.bf16.msra.mxu1 %v267_v5 }
   0xa   :  { %249 = vmatprep.subr.bf16.mxu1 %v302_v1  ;;  %p285_p3 = por %p284_p2, %p283_p1 }
   0xc   :  { %p286_p4 = pnand %p285_p3, %p279_p0 }
   0xd   :  { %250 = vmatpush3.bf16.msra.mxu1 %v268_v6 }
   0xe   :  { %251 = vmatprep.subr.bf16.mxu1 %v302_v1 }
  0x11   :  { %252 = vmatpush3.bf16.msra.mxu1 %v269_v7 }
  0xdc   :  { %v77_v8 = vpop.f32.mrb[0].mxu0 }
  0xdd   :  { %100 = vrot.lane.b32.xlu0 %v77_v8, %s304_s24  ;;  %v243_v9 = vpop.f32.mrb[1].mxu0  ;;  %v222_v12 = vmul.f32 -1.442695, %v77_v8 }
  0xde   :  { %v80_v10 = vpop.f32.mrb[2].mxu0 }
  0xdf   :  { %v244_v11 = vpop.f32.mrb[3].mxu0  ;;  %v223_v13 = vmul.f32 -1.442695, %v80_v10  ;;  %270 = vpow2.f32 %v222_v12 }
  0xe1   :  { %102 = vrot.lane.b32.xlu0 %v80_v10, %s304_s24  ;;  %272 = vpow2.f32 %v223_v13 }
  0xe9   :  { %v271_v14 = vpop.eup %270 }
  0xea   :  { %v90_v16 = vadd.f32 1.0, %v271_v14 }
  0xeb   :  { %v273_v15 = vpop.eup %272 }
  0xec   :  { %v91_v17 = vadd.f32 1.0, %v273_v15  ;;  %274 = vrcp.f32 %v90_v16 }
  0xee   :  { %276 = vrcp.f32 %v91_v17 }
  0xf6   :  { %v275_v18 = vpop.eup %274 }
  0xf7   :  { %v96_v21 = vmul.f32 %v275_v18, %v77_v8 }
  0xf8   :  { %v277_v19 = vpop.eup %276 }
  0xf9   :  { %v97_v22 = vmul.f32 %v277_v19, %v80_v10 }
 0x14f   :  { %v101_v20 = vpop.permute.xlu0 %100 }
 0x150   :  { %v106_v24 = vmul.f32 %v101_v20, %v96_v21 }
 0x153   :  { %v103_v23 = vpop.permute.xlu0 %102 }
 0x154   :  { %v107_v25 = vmul.f32 %v103_v23, %v97_v22 }
 0x156   :  { %v108_v26 = vpack.c.bf16 %v107_v25, %v106_v24 }
 0x158   :  { %254 = vmatmul.mubr.msk.bf16.vlgmr.msra.gmra.mrb[0].mxu1 %vm141_vm2, %v108_v26 }
 0x22b   :  { %v179_v27 = vpop.f32.mrb[0].mxu1 }
 0x22c   :  { %190 = vst.msk [vmem:[#allocation2] sm:$0xff] %vm39_vm1, %v179_v27  ;;  %v255_v28 = vpop.f32.mrb[1].mxu1 }
 0x22d   :  { %v182_v29 = vpop.f32.mrb[2].mxu1 }
 0x22e   :  { %191 = vst.msk [vmem:[#allocation2 + $0x8] sm:$0xff] %vm39_vm1, %v182_v29  ;;  %v256_v30 = vpop.f32.mrb[3].mxu1 }
 0x22f   :  { %289 = shalt.err (!%p286_p4)
}
 0x230   :  { %s290_s29 = scalar_lea.hbm %s367_s3, 256 }
 0x231   :  { %p291_p5 = scmp.ne.s32.totalorder %s367_s3, %s290_s29  ;;  %p294_p6 = scmp.lt.u32.totalorder %s290_s29, %s367_s3 }
 0x233   :  { %p296_p7 = pnand %p294_p6, %p291_p5 }
 0x235   :  { %299 = shalt.err (!%p296_p7)
}
 0x236   :  { %s306_s7 = smov 128   ;;  %s307_s8 = smov 8  }
 0x237   :  { %213 = dma.vmem_to_hbm [thread:$0]  %s208_s25, 256, %s367_s3, [#allocation3], %s306_s7, %s306_s7, %s307_s8  }
 0x238   :  { %300 = dma.done.wait [#allocation3], 256  }
 0x239   :  { %301 = vsyncadd [#allocation3], 4294967040 }
 0x23a   :  { %217 = vsyncpa [#allocation3], 1 }

</bundles_post_ra>
